<compile_context>
chip_gen: v5e
topology: v5e:2x2
jax: 0.10.0
libtpu: 0.0.40
codegen_flags: <defaults>
</compile_context>

<pallas_src>
import jax
import jax.numpy as jnp
from jax.experimental import pallas as pl
from jax.experimental.pallas import tpu as pltpu


def _round_up(x: int, m: int) -> int:
    return ((x + m - 1) // m) * m


# ----------------------------------------------------------------------------- kernel

def _value_fn_kernel(x_ref, w1_ref, b1_ref, w2_ref, b2_ref, out_ref):
    # x_ref : (TB, D)  f32   -- streamed state tile (raw width, no lane padding)
    # w1_ref: (D, Hp)  bf16  -- resident in VMEM (constant index_map)
    # b1_ref: (1, Hp)  f32   -- resident
    # w2_ref: (1, Hp)  f32   -- resident (second-layer weight as a row)
    # b2_ref: (1, 1)   f32   -- SMEM scalar
    # out_ref: (TB, 1) f32
    x = x_ref[...].astype(jnp.bfloat16)  # in-kernel cast: state streams at native f32 width

    # Layer 1: bf16 MXU matmul with f32 accumulation; bias + ReLU in f32 on the VPU.
    h = jnp.dot(x, w1_ref[...], preferred_element_type=jnp.float32) + b1_ref[...]
    h = jnp.maximum(h, 0.0)

    # Layer 2: H -> 1 projection as elementwise multiply (VALU) + lane reduction (XLU),
    # instead of an H x 1 matmul that would use a single MXU output column.
    v = jnp.sum(h * w2_ref[...], axis=-1, keepdims=True) + b2_ref[0, 0]
    out_ref[...] = v.astype(out_ref.dtype)


# ----------------------------------------------------------------------------- wrapper

def prepare_value_fn_params(w1, b1, w2, b2):
    """Pad/cast the (constant) parameters once, outside the per-call path.

    w1: (D, H);  b1: (1, H) or (H,);  w2: (H, 1) or (H,);  b2: scalar / (1, 1).
    """
    D, H = w1.shape
    H_pad = _round_up(H, 128)
    w1_p = jnp.pad(w1, ((0, 0), (0, H_pad - H))).astype(jnp.bfloat16)
    b1_p = jnp.pad(jnp.reshape(b1, (1, -1)), ((0, 0), (0, H_pad - H))).astype(jnp.float32)
    w2_p = jnp.pad(jnp.reshape(w2, (1, -1)), ((0, 0), (0, H_pad - H))).astype(jnp.float32)
    b2_p = jnp.reshape(b2, (1, 1)).astype(jnp.float32)
    return w1_p, b1_p, w2_p, b2_p


def _cap_tb_for_vmem(tb: int, D: int, H_pad: int, budget_bytes: int = 24 << 20) -> int:
    # Live VMEM per grid step: resident weights + 2x-buffered f32 state tile
    # + f32 hidden intermediate + 2x-buffered f32 (tb, 1) output.
    resident = D * H_pad * 2 + 2 * H_pad * 4 + 4096
    per_row = 2 * D * 4 + H_pad * 4 + 2 * 4
    max_rows = max(8, (budget_bytes - resident) // max(per_row, 1))
    max_rows = (max_rows // 8) * 8
    return max(8, min(tb, max_rows))


def _choose_tb(B: int, block_b: int, D: int, H_pad: int) -> int:
    tb = min(max(block_b, 8), _round_up(B, 8))
    # v7x megacore: give the batch grid >= 2 steps when B is large enough to split.
    if B > 16:
        tb = min(tb, _round_up((B + 1) // 2, 8))
    tb = _cap_tb_for_vmem(tb, D, H_pad)
    return max(8, tb)


def base_value_fn(state, params, *, block_b: int = 1024):
    """value = net(state) with net = MLP(D -> H -> 1).

    state: (B, D) f32 (passed raw, unpadded);  params = prepare_value_fn_params(w1, b1, w2, b2).
    Returns (B, 1) f32.
    """
    w1_p, b1_p, w2_p, b2_p = params
    B, D = state.shape
    assert w1_p.shape[0] == D, "state feature dim must match w1"
    H_pad = w1_p.shape[1]

    tb = _choose_tb(B, block_b, D, H_pad)
    grid = (pl.cdiv(B, tb),)  # ragged last block handled by Pallas; no batch padding

    out = pl.pallas_call(
        _value_fn_kernel,
        out_shape=jax.ShapeDtypeStruct((B, 1), jnp.float32),
        grid=grid,
        in_specs=[
            pl.BlockSpec((tb, D), lambda i: (i, 0)),            # state: streamed, raw width
            pl.BlockSpec((D, H_pad), lambda i: (0, 0)),         # w1: resident in VMEM
            pl.BlockSpec((1, H_pad), lambda i: (0, 0)),         # b1: resident in VMEM
            pl.BlockSpec((1, H_pad), lambda i: (0, 0)),         # w2 row: resident in VMEM
            pl.BlockSpec(memory_space=pltpu.MemorySpace.SMEM),  # b2: scalar in SMEM
        ],
        out_specs=pl.BlockSpec((tb, 1), lambda i: (i, 0)),
        compiler_params=pltpu.CompilerParams(
            dimension_semantics=("parallel",),                  # shard batch across v7x's 2 TCs
        ),
    )(state, w1_p, b1_p, w2_p, b2_p)

    return out


def _reference(state, w1, b1, w2, b2):
    # Mirrors the kernel's numerics: bf16 matmul inputs, f32 accumulate, f32 layer 2.
    h = jnp.dot(state.astype(jnp.bfloat16), w1.astype(jnp.bfloat16),
                preferred_element_type=jnp.float32) + b1.reshape(1, -1)
    h = jnp.maximum(h, 0.0)
    return jnp.sum(h * w2.reshape(1, -1), axis=-1, keepdims=True) + b2.reshape(1, 1)


if __name__ == "__main__":
    key = jax.random.PRNGKey(0)
    k_x, k_w1, k_b1, k_w2, k_b2 = jax.random.split(key, 5)

    B, D, H = 64, 32, 32  # batch, state_dim, hidden

    state = jax.random.normal(k_x, (B, D), dtype=jnp.float32)
    w1 = jax.random.normal(k_w1, (D, H), dtype=jnp.float32) * 0.1
    b1 = jax.random.normal(k_b1, (1, H), dtype=jnp.float32) * 0.1
    w2 = jax.random.normal(k_w2, (H, 1), dtype=jnp.float32) * 0.1
    b2 = jax.random.normal(k_b2, (1, 1), dtype=jnp.float32) * 0.1

    params = prepare_value_fn_params(w1, b1, w2, b2)  # pad/cast weights once, not per call

    value = base_value_fn(state, params)
    value = jax.block_until_ready(value)

    ref = _reference(state, w1, b1, w2, b2)
    assert value.shape == (B, 1)
    assert jnp.allclose(value, ref, atol=1e-3, rtol=1e-3), (
        float(jnp.max(jnp.abs(value - ref))))

    print("KERNEL_OK")
</pallas_src>

<mosaic_0001>
module attributes {stable_mosaic.version = 11 : i64} {
  func.func @_value_fn_kernel(%arg0: i32, %arg1: memref<32x32xf32, #tpu.memory_space<vmem>>, %arg2: memref<32x128xbf16, #tpu.memory_space<vmem>>, %arg3: memref<1x128xf32, #tpu.memory_space<vmem>>, %arg4: memref<1x128xf32, #tpu.memory_space<vmem>>, %arg5: memref<1x1xf32, #tpu.memory_space<smem>>, %arg6: memref<32x1xf32, #tpu.memory_space<vmem>>) attributes {dimension_semantics = [#tpu.dimension_semantics<parallel>], iteration_bounds = array<i64: 2>, scalar_prefetch = 0 : i64, scratch_operands = 0 : i64, tpu.core_type = #tpu.core_type<tc>, window_params = [{transform_indices = @transform_0, window_bounds = array<i64: 32, 32>}, {pipeline_mode = #tpu.pipeline_mode<synchronous>, transform_indices = @transform_1, window_bounds = array<i64: 32, 128>}, {pipeline_mode = #tpu.pipeline_mode<synchronous>, transform_indices = @transform_2, window_bounds = array<i64: 1, 128>}, {pipeline_mode = #tpu.pipeline_mode<synchronous>, transform_indices = @transform_3, window_bounds = array<i64: 1, 128>}, {transform_indices = @transform_4, window_bounds = array<i64: 1, 1>}, {transform_indices = @transform_5, window_bounds = array<i64: 32, 1>}]} {
    %c0 = arith.constant 0 : index
    %c0_0 = arith.constant 0 : index
    %0 = vector.load %arg1[%c0, %c0_0] : memref<32x32xf32, #tpu.memory_space<vmem>>, vector<32x32xf32>
    %1 = arith.truncf %0 : vector<32x32xf32> to vector<32x32xbf16>
    %c0_1 = arith.constant 0 : index
    %c0_2 = arith.constant 0 : index
    %2 = vector.load %arg2[%c0_1, %c0_2] : memref<32x128xbf16, #tpu.memory_space<vmem>>, vector<32x128xbf16>
    %cst = arith.constant dense<0.000000e+00> : vector<32x128xf32>
    %3 = tpu.matmul %1, %2, %cst {dimension_numbers = #tpu.dot_dimension_numbers<[1], [0], [0], [1], [0, 0, 1, 1], [], []>} : vector<32x32xbf16>, vector<32x128xbf16>, vector<32x128xf32> -> vector<32x128xf32>
    %c0_3 = arith.constant 0 : index
    %c0_4 = arith.constant 0 : index
    %4 = vector.load %arg3[%c0_3, %c0_4] : memref<1x128xf32, #tpu.memory_space<vmem>>, vector<1x128xf32>
    %5 = vector.broadcast %4 : vector<1x128xf32> to vector<32x128xf32>
    %6 = arith.addf %3, %5 : vector<32x128xf32>
    %cst_5 = arith.constant 0.000000e+00 : f32
    %7 = vector.broadcast %cst_5 : f32 to vector<32x128xf32>
    %8 = arith.maximumf %6, %7 : vector<32x128xf32>
    %c0_6 = arith.constant 0 : index
    %c0_7 = arith.constant 0 : index
    %9 = vector.load %arg4[%c0_6, %c0_7] : memref<1x128xf32, #tpu.memory_space<vmem>>, vector<1x128xf32>
    %10 = vector.broadcast %9 : vector<1x128xf32> to vector<32x128xf32>
    %11 = arith.mulf %8, %10 : vector<32x128xf32>
    %cst_8 = arith.constant dense<0.000000e+00> : vector<32xf32>
    %12 = vector.multi_reduction <add>, %11, %cst_8 [1] : vector<32x128xf32> to vector<32xf32>
    %13 = vector.shape_cast %12 : vector<32xf32> to vector<32x1xf32>
    %c0_9 = arith.constant 0 : index
    %c0_10 = arith.constant 0 : index
    %14 = memref.load %arg5[%c0_9, %c0_10] : memref<1x1xf32, #tpu.memory_space<smem>>
    %15 = vector.broadcast %14 : f32 to vector<32x1xf32>
    %16 = arith.addf %13, %15 : vector<32x1xf32>
    %c0_11 = arith.constant 0 : index
    %c0_12 = arith.constant 0 : index
    %17 = vector.load %arg6[%c0_11, %c0_12] : memref<32x1xf32, #tpu.memory_space<vmem>>, vector<32x1xf32>
    tpu.vector_store %arg6[%c0_11, %c0_12], %16 {strides = array<i32>} : memref<32x1xf32, #tpu.memory_space<vmem>>, vector<32x1xf32>,
    return
  }
  func.func @transform_0(%arg0: i32) -> (i32, i32) {
    %c0_i32 = arith.constant 0 : i32
    %c0_i32_0 = arith.constant 0 : i32
    return %arg0, %c0_i32 : i32, i32
  }
  func.func @transform_1(%arg0: i32) -> (i32, i32) {
    %c0_i32 = arith.constant 0 : i32
    %c0_i32_0 = arith.constant 0 : i32
    %c0_i32_1 = arith.constant 0 : i32
    return %c0_i32, %c0_i32_0 : i32, i32
  }
  func.func @transform_2(%arg0: i32) -> (i32, i32) {
    %c0_i32 = arith.constant 0 : i32
    %c0_i32_0 = arith.constant 0 : i32
    %c0_i32_1 = arith.constant 0 : i32
    return %c0_i32, %c0_i32_0 : i32, i32
  }
  func.func @transform_3(%arg0: i32) -> (i32, i32) {
    %c0_i32 = arith.constant 0 : i32
    %c0_i32_0 = arith.constant 0 : i32
    %c0_i32_1 = arith.constant 0 : i32
    return %c0_i32, %c0_i32_0 : i32, i32
  }
  func.func @transform_4(%arg0: i32) -> (i32, i32) {
    %c0_i32 = arith.constant 0 : i32
    %c0_i32_0 = arith.constant 0 : i32
    %c0_i32_1 = arith.constant 0 : i32
    return %c0_i32, %c0_i32_0 : i32, i32
  }
  func.func @transform_5(%arg0: i32) -> (i32, i32) {
    %c0_i32 = arith.constant 0 : i32
    %c0_i32_0 = arith.constant 0 : i32
    return %arg0, %c0_i32 : i32, i32
  }
}

</mosaic_0001>

<bundles_post_ra>
// kernel: tpu_custom_call.1
= control target key start
LH: loop header
LB: loop body
LE: loop exit
PB: predicated region body
PF: predicated region fallthrough
CT: control target
= control target key end

     0   :  { %s445_s20 = smov 0   ;;  %s481_s0 = inlined_call_operand.vmem [shape: f32[64,32], index: 0, kind: input, shape index: {}]   ;;  %s482_s1 = inlined_call_operand.vmem [shape: bf16[32,128], index: 1, kind: input, shape index: {}]   ;;  %s483_s2 = inlined_call_operand.vmem [shape: f32[1,128], index: 2, kind: input, shape index: {}]   ;;  %s484_s3 = inlined_call_operand.vmem [shape: f32[1,128], index: 3, kind: input, shape index: {}]   ;;  %s485_s4 = inlined_call_operand.<no memory space> [shape: f32[1,1], index: 4, kind: input, shape index: {}]   ;;  %s486_s5 = inlined_call_operand.vmem [shape: f32[64,1], index: 5, kind: output, shape index: {}]  }
   0x1   :  { %10 = sst [smem:[#allocation2]] %s485_s4 }
   0x2 LB: > { %s369_s21 = sadd.s32 4294967295, %s410_s20   ;;  %p373_p0 = scmp.ge.s32.totalorder %s410_s20, 1  ;;  %s410_s20 = sphi %s445_s20, %s16_s20  }
   0x3   : > { %p189_p1 = scmp.lt.s32.totalorder %s410_s20, 3 }
   0x5   : > { %p190_p2 = pnand %p373_p0, %p189_p1 }
   0x6   : > { %s374_s4 = sshll.u32 (!%p190_p2), %s369_s21, 2  ;;  %s302_s9 = sld [smem:[#allocation2]] (!%p190_p2) }
   0x7   : > { %193 = sbr.rel (%p190_p2) target bundleno = 280 (0x118), region = 40  ;;  %p218_p3 = scmp.lt.s32.totalorder (!%p190_p2), %s374_s4, 7 }
   0xc   : > { %v391_v0 = vld [vmem:[%s482_s1 + $0x8] sm:$0xff]  ;;  %v390_v1 = vld [vmem:[%s482_s1] sm:$0xff]  ;;  %s488_s4 = smov (!%p218_p3, %s374_s4), 7  ;;  %vm256_vm0 = vcmask 261120   ;;  %v303_v26 = vstv %s302_s9  ;;  %vm308_vm1 = vcmask 7168  }
   0xd   : > { %269 = vmatpush.bf16.msra.mxu0 %v391_v0  ;;  %392 = vmatpush.bf16.msra.mxu1 %v391_v0  ;;  %s375_s26 = sshll.u32 %s488_s4, 3  ;;  %v402_v8 = vld [vmem:[%s483_s2] ss:$0 sm:$0xff] }
   0xe   : > { %s221_s29 = scalar_lea.vmem %s481_s0, %s375_s26  ;;  %v403_v12 = vld [vmem:[%s484_s3] ss:$0 sm:$0xff]  ;;  %s227_s12 = scalar_lea.vmem %s486_s5, %s375_s26 }
   0xf   : > { %v230_v2 = vld [vmem:[%s221_s29] sm:$0xff]  ;;  %v231_v3 = vld [vmem:[%s221_s29 + $0x8] sm:$0xff]  ;;  %v232_v4 = vld [vmem:[%s221_s29 + $0x10] sm:$0xff] }
  0x10   : > { %v234_v5 = vpack.c.bf16 %v231_v3, %v230_v2  ;;  %v233_v6 = vld [vmem:[%s221_s29 + $0x18] sm:$0xff] }
  0x11   : > { %270 = vmatpush.bf16.msra.mxu0 %v390_v1  ;;  %393 = vmatpush.bf16.msra.mxu1 %v390_v1  ;;  %v235_v7 = vpack.c.bf16 %v233_v6, %v232_v4 }
  0x14   : > { %386 = vmatmul.msk.bf16.vlgmr.msra.gmra.mxu0 %vm256_vm0, %v234_v5  ;;  %387 = vmatmul.msk.bf16.vlgmr.msra.gmra.mxu1 %vm256_vm0, %v235_v7 }
  0x91   : > { %v272_v9 = vpop.f32.mrf.mxu0  ;;  %v277_v11 = vpop.f32.mrf.mxu1 }
  0x92   : > { %v273_v10 = vadd.f32 %v402_v8, %v272_v9  ;;  %v278_v13 = vadd.f32 %v402_v8, %v277_v11 }
  0x94   : > { %v282_v14 = vmax.f32 %v273_v10, 0.0  ;;  %v284_v15 = vmax.f32 %v278_v13, 0.0 }
  0x96   : > { %v290_v16 = vmul.f32 %v403_v12, %v282_v14  ;;  %v292_v17 = vmul.f32 %v403_v12, %v284_v15 }
  0x98   : > { %294 = vadd.xlane.f32.xlu0 %v290_v16  ;;  %298 = vadd.xlane.f32.xlu1 %v292_v17 }
  0x99   : > { %v274_v18 = vpop.f32.mrf.mxu0  ;;  %v279_v20 = vpop.f32.mrf.mxu1 }
  0x9a   : > { %v275_v19 = vadd.f32 %v402_v8, %v274_v18  ;;  %v280_v21 = vadd.f32 %v402_v8, %v279_v20 }
  0x9c   : > { %v283_v22 = vmax.f32 %v275_v19, 0.0  ;;  %v285_v23 = vmax.f32 %v280_v21, 0.0 }
  0x9e   : > { %v291_v24 = vmul.f32 %v403_v12, %v283_v22  ;;  %v293_v25 = vmul.f32 %v403_v12, %v285_v23 }
  0xa0   : > { %296 = vadd.xlane.f32.xlu0 %v291_v24  ;;  %300 = vadd.xlane.f32.xlu1 %v293_v25 }
 0x10b   : > { %v295_v27 = vpop.xlane.xlu0 %294  ;;  %v299_v28 = vpop.xlane.xlu1 %298 }
 0x10c   : > { %v304_v29 = vadd.f32 %v303_v26, %v295_v27  ;;  %v306_v33 = vadd.f32 %v303_v26, %v299_v28 }
 0x10e   : > { %309 = vst.msk [vmem:[%s227_s12] sm:$0xff] %vm308_vm1, %v304_v29 }
 0x10f   : > { %311 = vst.msk [vmem:[%s227_s12 + $0x10] sm:$0xff] %vm308_vm1, %v306_v33 }
 0x113   : > { %v297_v30 = vpop.xlane.xlu0 %296  ;;  %v301_v31 = vpop.xlane.xlu1 %300 }
 0x114   : > { %v305_v32 = vadd.f32 %v303_v26, %v297_v30  ;;  %v307_v34 = vadd.f32 %v303_v26, %v301_v31 }
 0x116   : > { %310 = vst.msk [vmem:[%s227_s12 + $0x8] sm:$0xff] %vm308_vm1, %v305_v32 }
 0x117   : > { %312 = vst.msk [vmem:[%s227_s12 + $0x18] sm:$0xff] %vm308_vm1, %v307_v34 }
 0x118 PF: > { %s16_s20 = sadd.s32 1, %s410_s20  }
 0x119   : > { %p13_p4 = scmp.ge.s32.totalorder %s16_s20, 4  }
 0x11b   :  { %15 = sbr.rel (!%p13_p4) target bundleno = 2 (0x2), region = 70 }

</bundles_post_ra>
